<compile_context>
chip_gen: v7x
topology: tpu7x:2x2x1
jax: 0.10.0
libtpu: 0.0.40
codegen_flags: <defaults>
</compile_context>

<pallas_src>
import functools

import jax
import jax.numpy as jnp
from jax.experimental import pallas as pl
from jax.experimental.pallas import tpu as pltpu


def _simam_kernel(x_ref, o_ref, *, hw, inv_n, e_lambda, padded):
    # x_ref: (row_tile, HW_pad) block in VMEM; padded columns are zero.
    x = x_ref[...].astype(jnp.float32)

    # Mean over the true HW region (padded columns are zero, so the plain sum
    # is already correct; divide by the true element count).
    mu = jnp.sum(x, axis=-1, keepdims=True) / float(hw)

    d = x - mu
    if padded:
        # Zero out the padded tail so it does not contribute to Sigma (x-mu)^2.
        col = jax.lax.broadcasted_iota(jnp.int32, x.shape, dimension=1)
        d = jnp.where(col < hw, d, 0.0)
    d2 = d * d

    # Sigma (x - mu)^2 over the true HW region — same two-pass formulation as
    # the PyTorch reference (no cancellation-prone sum(x^2) - sum(x)^2 trick).
    s = jnp.sum(d2, axis=-1, keepdims=True)

    # Per-row scale 1 / (4 * (s/n + e_lambda)): full-precision reciprocal on a
    # (rows, 1) vector, then a cheap broadcast multiply over the tile.
    inv_denom = 1.0 / (4.0 * (s * inv_n + e_lambda))
    y = d2 * inv_denom + 0.5

    # y >= 0.5, so 1 / (1 + exp(-y)) is the numerically stable sigmoid form.
    sig = 1.0 / (1.0 + jnp.exp(-y))

    o_ref[...] = (x * sig).astype(o_ref.dtype)


def _pick_row_tile(rows, hw_pad, itemsize, target_bytes=2 << 20):
    """Rows per grid step: ~2 MiB per input block, multiple of 8, and keep
    >= 2 grid steps when possible (v7x has 2 TensorCores)."""
    if rows <= 8:
        return rows                      # full-extent block along rows
    per_row = max(1, hw_pad * itemsize)
    t = max(8, ((target_bytes // per_row) // 8) * 8)
    if rows >= 16:
        t = min(t, max(8, ((rows // 2) // 8) * 8))
    else:
        t = rows                         # 9..15 rows: single full-extent block
    return t


def simam(x, e_lambda=1e-4):
    """SimAM forward. x: (B, C, H, W) array (any float dtype)."""
    b, c, h, w = x.shape
    hw = h * w
    n = hw - 1
    rows = b * c

    # Pad the spatial axis to a multiple of 128 so the lane axis is dense.
    hw_pad = ((hw + 127) // 128) * 128
    x2d = x.reshape(rows, hw)
    if hw_pad != hw:
        x2d = jnp.pad(x2d, ((0, 0), (0, hw_pad - hw)))

    itemsize = jnp.dtype(x.dtype).itemsize
    row_tile = _pick_row_tile(rows, hw_pad, itemsize)
    grid = (pl.cdiv(rows, row_tile),)

    # VMEM budget: in + out, double-buffered, plus slack for f32 intermediates.
    # Stays <= 48 MiB so it also fits v7x's 64 MiB VMEM.
    block_bytes = row_tile * hw_pad * itemsize
    vmem_limit = int(min(48 << 20, max(32 << 20, 6 * block_bytes)))
    # TODO(synk): for very large HW (e.g. 512x512 f32) a two-pass scheme over a
    # second "arbitrary" HW grid axis would keep blocks small on v7x.

    # H=W=1 -> n=0: 0 * inf = nan, matching PyTorch's divide-by-zero behavior.
    inv_n = (1.0 / n) if n > 0 else float("inf")

    out2d = pl.pallas_call(
        functools.partial(
            _simam_kernel,
            hw=hw,
            inv_n=inv_n,
            e_lambda=float(e_lambda),
            padded=(hw_pad != hw),
        ),
        out_shape=jax.ShapeDtypeStruct((rows, hw_pad), x.dtype),
        grid_spec=pltpu.PrefetchScalarGridSpec(
            num_scalar_prefetch=0,
            grid=grid,
            in_specs=[pl.BlockSpec((row_tile, hw_pad), lambda i: (i, 0))],
            out_specs=pl.BlockSpec((row_tile, hw_pad), lambda i: (i, 0)),
        ),
        compiler_params=pltpu.CompilerParams(
            dimension_semantics=("parallel",),
            vmem_limit_bytes=vmem_limit,
        ),
    )(x2d)

    if hw_pad != hw:
        out2d = out2d[:, :hw]
    return out2d.reshape(b, c, h, w)


def simam_ref(x, e_lambda=1e-4):
    """Pure-JAX reference mirroring the PyTorch forward."""
    b, c, h, w = x.shape
    n = w * h - 1
    mu = jnp.mean(x, axis=(2, 3), keepdims=True)
    d2 = (x - mu) ** 2
    y = d2 / (4.0 * (jnp.sum(d2, axis=(2, 3), keepdims=True) / n + e_lambda)) + 0.5
    return x * jax.nn.sigmoid(y)


if __name__ == "__main__":
    key = jax.random.PRNGKey(0)

    # Primary check: lane-aligned spatial size (HW = 256).
    B, C, H, W = 2, 4, 16, 16
    x = jax.random.normal(key, (B, C, H, W), dtype=jnp.float32)
    out = jax.block_until_ready(simam(x))
    ref = simam_ref(x)
    assert out.shape == (B, C, H, W)
    assert out.dtype == x.dtype
    assert jnp.allclose(out, ref, atol=1e-3, rtol=1e-3), "mismatch vs reference (aligned)"

    # Secondary check: non-multiple-of-128 spatial size exercises the padding path.
    x2 = jax.random.normal(jax.random.PRNGKey(1), (2, 4, 7, 7), dtype=jnp.float32)
    out2 = jax.block_until_ready(simam(x2))
    ref2 = simam_ref(x2)
    assert jnp.allclose(out2, ref2, atol=1e-3, rtol=1e-3), "mismatch vs reference (padded)"

    print("KERNEL_OK")
</pallas_src>

<mosaic_0001>
module attributes {stable_mosaic.version = 11 : i64} {
  func.func @_simam_kernel(%arg0: i32, %arg1: memref<8x256xf32, #tpu.memory_space<vmem>>, %arg2: memref<8x256xf32, #tpu.memory_space<vmem>>) attributes {dimension_semantics = [#tpu.dimension_semantics<parallel>], iteration_bounds = array<i64: 1>, scalar_prefetch = 0 : i64, scratch_operands = 0 : i64, tpu.core_type = #tpu.core_type<tc>, window_params = [{transform_indices = @transform_0, window_bounds = array<i64: 8, 256>}, {transform_indices = @transform_1, window_bounds = array<i64: 8, 256>}]} {
    %c0 = arith.constant 0 : index
    %c0_0 = arith.constant 0 : index
    %0 = vector.load %arg1[%c0, %c0_0] : memref<8x256xf32, #tpu.memory_space<vmem>>, vector<8x256xf32>
    %cst = arith.constant dense<0.000000e+00> : vector<8xf32>
    %1 = vector.multi_reduction <add>, %0, %cst [1] : vector<8x256xf32> to vector<8xf32>
    %2 = vector.shape_cast %1 : vector<8xf32> to vector<8x1xf32>
    %cst_1 = arith.constant 2.560000e+02 : f32
    %3 = vector.broadcast %cst_1 : f32 to vector<8x1xf32>
    %4 = arith.divf %2, %3 : vector<8x1xf32>
    %5 = vector.broadcast %4 : vector<8x1xf32> to vector<8x256xf32>
    %6 = arith.subf %0, %5 : vector<8x256xf32>
    %7 = arith.mulf %6, %6 : vector<8x256xf32>
    %cst_2 = arith.constant dense<0.000000e+00> : vector<8xf32>
    %8 = vector.multi_reduction <add>, %7, %cst_2 [1] : vector<8x256xf32> to vector<8xf32>
    %9 = vector.shape_cast %8 : vector<8xf32> to vector<8x1xf32>
    %cst_3 = arith.constant 0.00392156886 : f32
    %10 = vector.broadcast %cst_3 : f32 to vector<8x1xf32>
    %11 = arith.mulf %9, %10 : vector<8x1xf32>
    %cst_4 = arith.constant 9.99999974E-5 : f32
    %12 = vector.broadcast %cst_4 : f32 to vector<8x1xf32>
    %13 = arith.addf %11, %12 : vector<8x1xf32>
    %cst_5 = arith.constant 4.000000e+00 : f32
    %14 = vector.broadcast %cst_5 : f32 to vector<8x1xf32>
    %15 = arith.mulf %14, %13 : vector<8x1xf32>
    %cst_6 = arith.constant 1.000000e+00 : f32
    %16 = vector.broadcast %cst_6 : f32 to vector<8x1xf32>
    %17 = arith.divf %16, %15 : vector<8x1xf32>
    %18 = vector.broadcast %17 : vector<8x1xf32> to vector<8x256xf32>
    %19 = arith.mulf %7, %18 : vector<8x256xf32>
    %cst_7 = arith.constant 5.000000e-01 : f32
    %20 = vector.broadcast %cst_7 : f32 to vector<8x256xf32>
    %21 = arith.addf %19, %20 : vector<8x256xf32>
    %cst_8 = arith.constant 0.000000e+00 : f32
    %22 = vector.broadcast %cst_8 : f32 to vector<8x256xf32>
    %23 = arith.subf %22, %21 : vector<8x256xf32>
    %24 = math.exp %23 : vector<8x256xf32>
    %cst_9 = arith.constant 1.000000e+00 : f32
    %25 = vector.broadcast %cst_9 : f32 to vector<8x256xf32>
    %26 = arith.addf %25, %24 : vector<8x256xf32>
    %cst_10 = arith.constant 1.000000e+00 : f32
    %27 = vector.broadcast %cst_10 : f32 to vector<8x256xf32>
    %28 = arith.divf %27, %26 : vector<8x256xf32>
    %29 = arith.mulf %0, %28 : vector<8x256xf32>
    %c0_11 = arith.constant 0 : index
    %c0_12 = arith.constant 0 : index
    %30 = vector.load %arg2[%c0_11, %c0_12] : memref<8x256xf32, #tpu.memory_space<vmem>>, vector<8x256xf32>
    tpu.vector_store %arg2[%c0_11, %c0_12], %29 {strides = array<i32>} : memref<8x256xf32, #tpu.memory_space<vmem>>, vector<8x256xf32>,
    return
  }
  func.func @transform_0(%arg0: i32) -> (i32, i32) {
    %c0_i32 = arith.constant 0 : i32
    %c0_i32_0 = arith.constant 0 : i32
    return %arg0, %c0_i32 : i32, i32
  }
  func.func @transform_1(%arg0: i32) -> (i32, i32) {
    %c0_i32 = arith.constant 0 : i32
    %c0_i32_0 = arith.constant 0 : i32
    return %arg0, %c0_i32 : i32, i32
  }
}

</mosaic_0001>

<bundles_post_ra>
// kernel: tpu_custom_call.1
= control target key start
LH: loop header
LB: loop body
LE: loop exit
PB: predicated region body
PF: predicated region fallthrough
CT: control target
= control target key end

     0   :  { %6 = vsyncpa [#allocation3], 0  ;;  %s171_s0 = inlined_call_operand.hbm [shape: f32[8,256], index: 0, kind: input, shape index: {}]   ;;  %s172_s1 = inlined_call_operand.hbm [shape: f32[8,256], index: 1, kind: output, shape index: {}]  }
   0x1   :  { %7 = vsyncpa [#allocation4], 0  ;;  %s135_s6 = smov [#allocation2]   ;;  %s87_s10 = scalar_lea.hbm %s171_s0, 256 }
   0x2   :  { %s14_s7 = sshll.u32 %s135_s6, 4  ;;  %p88_p0 = scmp.ne.s32.totalorder %s171_s0, %s87_s10  ;;  %s15_s7 = int_to_ptr.vmem [resolvable:$true] %s14_s7 }
   0x3   :  { %p91_p1 = scmp.lt.u32.totalorder %s87_s10, %s171_s0 }
   0x5   :  { %p93_p2 = pnand %p91_p1, %p88_p0 }
   0x7   :  { %96 = shalt.err (!%p93_p2)
}
   0x8   :  { %s97_s15 = scalar_lea.vmem %s15_s7, 256  ;;  %p102_p4 = scmp.lt.s32.totalorder %s15_s7, %s15_s7 }
   0x9   :  { %p98_p3 = scmp.ne.s32.totalorder %s15_s7, %s97_s15  ;;  %p103_p5 = scmp.lt.s32.totalorder %s97_s15, %s97_s15 }
   0xb   :  { %p104_p6 = por %p103_p5, %p102_p4 }
   0xd   :  { %p105_p7 = pnand %p104_p6, %p98_p3 }
   0xf   :  { %108 = shalt.err (!%p105_p7)
}
  0x10   :  { %17 = dma.hbm_to_vmem [thread:$0]  %s171_s0, 256, %s15_s7, [#allocation3]  }
  0x11   :  { %131 = dma.done.wait [#allocation3], 256  }
  0x12   :  { %132 = vsyncadd [#allocation3], 4294967040  ;;  %v21_v0 = vld [vmem:[#allocation2] sm:$0xff]  ;;  %v22_v1 = vld [vmem:[#allocation2 + $0x8] sm:$0xff]  ;;  %s136_s0 = smov [#allocation5]  }
  0x13   :  { %v23_v2 = vadd.f32 %v22_v1, %v21_v0  ;;  %s66_s18 = sshll.u32 %s136_s0, 4  ;;  %s67_s18 = int_to_ptr.vmem [resolvable:$true] %s66_s18 }
  0x14   :  { %s109_s19 = scalar_lea.vmem %s67_s18, 256  ;;  %p114_p9 = scmp.lt.s32.totalorder %s67_s18, %s67_s18 }
  0x15   :  { %24 = vadd.xlane.f32.xlu0 %v23_v2  ;;  %p110_p8 = scmp.ne.s32.totalorder %s67_s18, %s109_s19  ;;  %p115_p10 = scmp.lt.s32.totalorder %s109_s19, %s109_s19 }
  0x17   :  { %p116_p11 = por %p115_p10, %p114_p9 }
  0x19   :  { %p117_p12 = pnand %p116_p11, %p110_p8 }
  0xa2   :  { %v25_v3 = vpop.xlane.xlu0 %24 }
  0xa3   :  { %v27_v4 = vmul.f32 0.00390625, %v25_v3 }
  0xa5   :  { %v28_v5 = vsub.f32 %v21_v0, %v27_v4  ;;  %v29_v6 = vsub.f32 %v22_v1, %v27_v4 }
  0xa7   :  { %v30_v7 = vmul.f32 %v28_v5, %v28_v5  ;;  %v31_v8 = vmul.f32 %v29_v6, %v29_v6 }
  0xa9   :  { %v32_v9 = vadd.f32 %v31_v8, %v30_v7 }
  0xab   :  { %33 = vadd.xlane.f32.xlu0 %v32_v9 }
 0x138   :  { %v34_v10 = vpop.xlane.xlu0 %33 }
 0x139   :  { %v35_v11 = vmul.f32 0.003921569, %v34_v10 }
 0x13b   :  { %v36_v12 = vadd.f32 0.0001, %v35_v11 }
 0x13d   :  { %v37_v13 = vmul.f32 4.0, %v36_v12 }
 0x13f   :  { %77 = vrcp.f32 %v37_v13 }
 0x149   :  { %v78_v14 = vpop.eup %77 }
 0x14a   :  { %v40_v15 = vmul.f32 %v78_v14, %v30_v7  ;;  %v41_v16 = vmul.f32 %v78_v14, %v31_v8 }
 0x14c   :  { %v42_v17 = vadd.f32 0.5, %v40_v15  ;;  %v43_v18 = vadd.f32 0.5, %v41_v16 }
 0x14e   :  { %v44_v19 = vsub.f32 0.0, %v42_v17  ;;  %v45_v20 = vsub.f32 0.0, %v43_v18 }
 0x150   :  { %v46_v21 = vmul.f32 1.442695, %v44_v19  ;;  %v48_v22 = vmul.f32 1.442695, %v45_v20 }
 0x152   :  { %79 = vpow2.f32 %v46_v21 }
 0x153   :  { %81 = vpow2.f32 %v48_v22 }
 0x15c   :  { %v80_v23 = vpop.eup %79 }
 0x15d   :  { %v82_v24 = vpop.eup %81  ;;  %v50_v25 = vadd.f32 1.0, %v80_v23 }
 0x15e   :  { %v51_v26 = vadd.f32 1.0, %v82_v24 }
 0x15f   :  { %83 = vrcp.f32 %v50_v25 }
 0x160   :  { %85 = vrcp.f32 %v51_v26 }
 0x169   :  { %v84_v27 = vpop.eup %83 }
 0x16a   :  { %v86_v28 = vpop.eup %85  ;;  %v56_v29 = vmul.f32 %v84_v27, %v21_v0 }
 0x16b   :  { %v57_v30 = vmul.f32 %v86_v28, %v22_v1 }
 0x16c   :  { %58 = vst [vmem:[#allocation5] sm:$0xff] %v56_v29 }
 0x16d   :  { %59 = vst [vmem:[#allocation5 + $0x8] sm:$0xff] %v57_v30 }
 0x16e   :  { %120 = shalt.err (!%p117_p12)
}
 0x16f   :  { %s121_s22 = scalar_lea.hbm %s172_s1, 256 }
 0x170   :  { %p122_p13 = scmp.ne.s32.totalorder %s172_s1, %s121_s22  ;;  %p125_p0 = scmp.lt.u32.totalorder %s121_s22, %s172_s1 }
 0x172   :  { %p127_p1 = pnand %p125_p0, %p122_p13 }
 0x174   :  { %130 = shalt.err (!%p127_p1)
}
 0x175   :  { %69 = dma.vmem_to_hbm [thread:$0]  %s67_s18, 256, %s172_s1, [#allocation4]  }
 0x176   :  { %133 = dma.done.wait [#allocation4], 256  }
 0x177   :  { %134 = vsyncadd [#allocation4], 4294967040 }
 0x178   :  { %73 = vsyncpa [#allocation3], 1 }
 0x179   :  { %74 = vsyncpa [#allocation4], 1 }

</bundles_post_ra>
